<compile_context>
chip_gen: v5e
topology: v5e:2x2
jax: 0.10.0
libtpu: 0.0.40
codegen_flags: <defaults>
</compile_context>

<pallas_src>
import functools
import numpy as np
import jax
import jax.numpy as jnp
from jax.experimental import pallas as pl
from jax.experimental.pallas import tpu as pltpu


# --------------------------------------------------------------------------
# Kernel: whole layer chain fused, operates on one row-tile of x.
# refs = [W_0, scale_0, shift_0, ..., W_{L-1}(placed), scale_{L-1}, shift_{L-1},
#         out_ref]
#   hidden W_i        : bf16 (c_in_i, c_out_i)
#   last  W_placed    : bf16 (G, c_last, packed_width)   (lane-band placed)
#   scale_i / shift_i : f32  (1, c_out_i)  /  (1, packed_width) for last layer
# --------------------------------------------------------------------------
def _fcblock_kernel(num_layers, last_relu, G, cs, x_ref, *refs):
    out_ref = refs[-1]
    h = x_ref[...]                                         # bf16 (tile_m, C_in)

    # Hidden layers: Linear(bias=False) -> BN(eval affine, f32) -> ReLU
    for i in range(num_layers - 1):
        w = refs[3 * i][...]                               # bf16
        sc = refs[3 * i + 1][...]                          # f32 (1, c_out)
        sh = refs[3 * i + 2][...]                          # f32 (1, c_out)
        acc = jnp.dot(h, w, preferred_element_type=jnp.float32) * sc + sh
        h = jnp.maximum(acc, 0.0).astype(jnp.bfloat16)

    # Last layer, lane-packed: G row-chunks of size cs land in G lane bands.
    j = 3 * (num_layers - 1)
    wp_ref = refs[j]                                       # bf16 (G, c_last, pw)
    sc = refs[j + 1][...]                                  # f32 (1, pw)
    sh = refs[j + 2][...]                                  # f32 (1, pw)
    acc = None
    for g in range(G):
        hg = h[g * cs:(g + 1) * cs, :]                     # (cs, c_last) bf16
        part = jnp.dot(hg, wp_ref[g], preferred_element_type=jnp.float32)
        acc = part if acc is None else acc + part          # exact zeros elsewhere
    acc = acc * sc + sh
    if last_relu:
        acc = jnp.maximum(acc, 0.0)
    out_ref[...] = acc.astype(out_ref.dtype)               # lane-dense store


# --------------------------------------------------------------------------
# Parameter construction (mirrors FCBlock.__init__); eval-mode BN kept as a
# separate f32 (scale, shift) affine (NOT folded into the bf16 weights).
# --------------------------------------------------------------------------
def init_fcblock_params(key, fc_cfg, input_channels, output_channels=None,
                        with_last_layer=True, eps=1e-5):
    if with_last_layer:
        assert output_channels is not None
    else:
        assert output_channels is None
        output_channels = fc_cfg[-1]

    def _bn_affine(k, c):
        k1, k2, k3, k4 = jax.random.split(k, 4)
        gamma = 1.0 + 0.1 * jax.random.normal(k1, (1, c), jnp.float32)
        beta = 0.1 * jax.random.normal(k2, (1, c), jnp.float32)
        mean = 0.1 * jax.random.normal(k3, (1, c), jnp.float32)
        var = 1.0 + 0.2 * jax.random.uniform(k4, (1, c), jnp.float32)
        scale = gamma / jnp.sqrt(var + eps)
        shift = beta - mean * scale
        return scale, shift

    weights, scales, shifts = [], [], []
    c_in = input_channels
    for k in range(len(fc_cfg) - 1):
        c_out = fc_cfg[k]
        key, kw, kb = jax.random.split(key, 3)
        w = jax.random.normal(kw, (c_in, c_out), jnp.float32) / np.sqrt(c_in)
        sc, sh = _bn_affine(kb, c_out)
        weights.append(w); scales.append(sc); shifts.append(sh)
        c_in = c_out

    key, kw, kb = jax.random.split(key, 3)
    w = jax.random.normal(kw, (c_in, output_channels), jnp.float32) / np.sqrt(c_in)
    weights.append(w)
    if with_last_layer:                      # plain Linear with bias
        b = 0.1 * jax.random.normal(kb, (1, output_channels), jnp.float32)
        scales.append(jnp.ones((1, output_channels), jnp.float32))
        shifts.append(b)
        last_relu = False
    else:                                    # Linear -> BN -> ReLU
        sc, sh = _bn_affine(kb, output_channels)
        scales.append(sc); shifts.append(sh)
        last_relu = True

    return weights, scales, shifts, last_relu, output_channels


# --------------------------------------------------------------------------
# Wrapper: row tiling, lane packing of the last layer, VMEM budget.
# --------------------------------------------------------------------------
def _round_up(n, m):
    return ((n + m - 1) // m) * m


def fcblock_forward(x, weights, scales, shifts, out_dim, last_relu,
                    tile_m=2048, out_dtype=jnp.float32, return_packed=False):
    N, c_in = x.shape
    c_last = weights[-1].shape[0]
    num_layers = len(weights)

    # ---- lane-packing geometry for the final layer ----
    if out_dim <= 128:
        out_cols = 1 << max(0, (out_dim - 1).bit_length())   # next pow2, divides 128
        G = 128 // out_cols
    else:
        out_cols = _round_up(out_dim, 128)
        G = 1
    packed_width = G * out_cols                               # multiple of 128

    # last-layer weight placed into its lane band per group: (G, c_last, pw)
    w_last = weights[-1]
    base_w = jnp.pad(w_last, ((0, 0), (0, out_cols - out_dim)))
    placed = [jnp.pad(base_w, ((0, 0), (g * out_cols, packed_width - (g + 1) * out_cols)))
              for g in range(G)]
    wp = jnp.stack(placed, axis=0).astype(jnp.bfloat16)
    sc_p = jnp.tile(jnp.pad(scales[-1], ((0, 0), (0, out_cols - out_dim))), (1, G))
    sh_p = jnp.tile(jnp.pad(shifts[-1], ((0, 0), (0, out_cols - out_dim))), (1, G))

    # ---- row tiling: big tiles, aligned to 16*G, and >=2 grid steps so
    #      v7x's two TensorCores can both work the "parallel" axis ----
    align = 16 * G
    n_min = _round_up(max(N, 1), align)
    tm = max(align, (min(int(tile_m), n_min) // align) * align)
    if n_min >= 2 * align and n_min // tm < 2:
        tm = _round_up((n_min + 1) // 2, align)
    n_pad = _round_up(n_min, tm)
    grid_m = n_pad // tm
    cs = tm // G                                              # chunk rows per lane band

    # ---- inputs / params (bf16 MXU operands, f32 affine) ----
    x_bf = x.astype(jnp.bfloat16)
    if n_pad != N:
        x_bf = jnp.pad(x_bf, ((0, n_pad - N), (0, 0)))

    params_flat = []
    for i in range(num_layers - 1):
        params_flat += [weights[i].astype(jnp.bfloat16),
                        scales[i].astype(jnp.float32),
                        shifts[i].astype(jnp.float32)]
    params_flat += [wp, sc_p.astype(jnp.float32), sh_p.astype(jnp.float32)]

    def _resident_spec(p):
        # constant index_map -> params stay VMEM-resident across the grid
        if p.ndim == 3:
            return pl.BlockSpec(p.shape, lambda i: (0, 0, 0))
        return pl.BlockSpec(p.shape, lambda i: (0, 0))

    in_specs = [pl.BlockSpec((tm, c_in), lambda i: (i, 0))]
    in_specs += [_resident_spec(p) for p in params_flat]
    out_spec = pl.BlockSpec((cs, packed_width), lambda i: (i, 0))

    # ---- explicit VMEM budget (params double-buffered by default) ----
    param_bytes = sum(p.size * p.dtype.itemsize for p in params_flat)
    out_itemsize = jnp.dtype(out_dtype).itemsize
    io_bytes = 2 * (tm * c_in * 2) + 2 * (cs * packed_width * out_itemsize)
    widths = [c_in] + [w.shape[1] for w in weights[:-1]] + [packed_width]
    inter_bytes = 4 * tm * max(widths) * 4
    vmem_needed = 2 * param_bytes + io_bytes + inter_bytes + (8 << 20)
    vmem_limit = int(min(max(vmem_needed, 32 << 20), 64 << 20))   # v7x physical = 64 MiB

    kernel = functools.partial(_fcblock_kernel, num_layers, last_relu, G, cs)

    out_packed = pl.pallas_call(
        kernel,
        out_shape=jax.ShapeDtypeStruct((n_pad // G, packed_width), out_dtype),
        grid_spec=pltpu.PrefetchScalarGridSpec(
            num_scalar_prefetch=0,
            grid=(grid_m,),
            in_specs=in_specs,
            out_specs=out_spec,
        ),
        compiler_params=pltpu.CompilerParams(
            dimension_semantics=("parallel",),
            vmem_limit_bytes=vmem_limit),
    )(x_bf, *params_flat)

    if return_packed:
        # Packed layout: row i*cs + r, lanes [g*out_cols, g*out_cols+out_dim)
        # hold logical row i*tm + g*cs + r.  Consumers can take this directly.
        return out_packed, (grid_m, cs, G, out_cols)

    out = out_packed.reshape(grid_m, cs, G, out_cols)
    out = out.transpose(0, 2, 1, 3).reshape(n_pad, out_cols)
    return out[:N, :out_dim]


# --------------------------------------------------------------------------
# Reference (same math / same precision path: bf16 matmul operands,
# f32 accumulation, f32 BN affine, ReLU).
# --------------------------------------------------------------------------
def fcblock_reference(x, weights, scales, shifts, last_relu):
    h = x.astype(jnp.bfloat16)
    n = len(weights)
    for i in range(n):
        acc = jnp.dot(h, weights[i].astype(jnp.bfloat16),
                      preferred_element_type=jnp.float32)
        acc = acc * scales[i].astype(jnp.float32) + shifts[i].astype(jnp.float32)
        if i < n - 1 or last_relu:
            acc = jnp.maximum(acc, 0.0)
        h = acc.astype(jnp.bfloat16) if i < n - 1 else acc
    return h


def _check(out, ref, shape):
    out_np = np.asarray(jnp.asarray(out, jnp.float32))
    ref_np = np.asarray(jnp.asarray(ref, jnp.float32))
    np.testing.assert_allclose(out_np, ref_np, rtol=1e-2, atol=1e-2)
    assert out_np.shape == shape


# --------------------------------------------------------------------------
if __name__ == "__main__":
    key = jax.random.PRNGKey(0)

    fc_cfg = [32, 32]
    input_channels = 16
    output_channels = 8

    kpa, kpb, kx1, kx2 = jax.random.split(key, 4)

    # Config A: FCBlock([32, 32], 16, output_channels=8, with_last_layer=True)
    w_a, sc_a, sh_a, relu_a, od_a = init_fcblock_params(
        kpa, fc_cfg, input_channels, output_channels, with_last_layer=True)

    # A1: small, non-aligned batch (exercises row padding, single grid step)
    x1 = jax.random.normal(kx1, (19, input_channels), jnp.float32)
    out = jax.block_until_ready(fcblock_forward(x1, w_a, sc_a, sh_a, od_a, relu_a))
    _check(out, fcblock_reference(x1, w_a, sc_a, sh_a, relu_a), (19, od_a))

    # A2: larger batch (>=2 grid steps; exercises the multi-tile packed layout)
    x2 = jax.random.normal(kx2, (300, input_channels), jnp.float32)
    out = jax.block_until_ready(fcblock_forward(x2, w_a, sc_a, sh_a, od_a, relu_a))
    _check(out, fcblock_reference(x2, w_a, sc_a, sh_a, relu_a), (300, od_a))

    # Config B: with_last_layer=False (last Linear + BN + ReLU), bf16 store path
    w_b, sc_b, sh_b, relu_b, od_b = init_fcblock_params(
        kpb, fc_cfg, input_channels, None, with_last_layer=False)
    out = jax.block_until_ready(
        fcblock_forward(x1, w_b, sc_b, sh_b, od_b, relu_b, out_dtype=jnp.bfloat16))
    _check(out, fcblock_reference(x1, w_b, sc_b, sh_b, relu_b), (19, od_b))

    print("KERNEL_OK")
</pallas_src>

<mosaic_0001>
module attributes {stable_mosaic.version = 11 : i64} {
  func.func @_fcblock_kernel(%arg0: i32, %arg1: memref<256x16xbf16, #tpu.memory_space<vmem>>, %arg2: memref<16x32xbf16, #tpu.memory_space<vmem>>, %arg3: memref<1x32xf32, #tpu.memory_space<vmem>>, %arg4: memref<1x32xf32, #tpu.memory_space<vmem>>, %arg5: memref<16x32x128xbf16, #tpu.memory_space<vmem>>, %arg6: memref<1x128xf32, #tpu.memory_space<vmem>>, %arg7: memref<1x128xf32, #tpu.memory_space<vmem>>, %arg8: memref<16x128xf32, #tpu.memory_space<vmem>>) attributes {dimension_semantics = [#tpu.dimension_semantics<parallel>], iteration_bounds = array<i64: 1>, scalar_prefetch = 0 : i64, scratch_operands = 0 : i64, tpu.core_type = #tpu.core_type<tc>, window_params = [{transform_indices = @transform_0, window_bounds = array<i64: 256, 16>}, {pipeline_mode = #tpu.pipeline_mode<synchronous>, transform_indices = @transform_1, window_bounds = array<i64: 16, 32>}, {pipeline_mode = #tpu.pipeline_mode<synchronous>, transform_indices = @transform_2, window_bounds = array<i64: 1, 32>}, {pipeline_mode = #tpu.pipeline_mode<synchronous>, transform_indices = @transform_3, window_bounds = array<i64: 1, 32>}, {pipeline_mode = #tpu.pipeline_mode<synchronous>, transform_indices = @transform_4, window_bounds = array<i64: 16, 32, 128>}, {pipeline_mode = #tpu.pipeline_mode<synchronous>, transform_indices = @transform_5, window_bounds = array<i64: 1, 128>}, {pipeline_mode = #tpu.pipeline_mode<synchronous>, transform_indices = @transform_6, window_bounds = array<i64: 1, 128>}, {transform_indices = @transform_7, window_bounds = array<i64: 16, 128>}]} {
    %c0 = arith.constant 0 : index
    %c0_0 = arith.constant 0 : index
    %0 = vector.load %arg1[%c0, %c0_0] : memref<256x16xbf16, #tpu.memory_space<vmem>>, vector<256x16xbf16>
    %c0_1 = arith.constant 0 : index
    %c0_2 = arith.constant 0 : index
    %1 = vector.load %arg2[%c0_1, %c0_2] : memref<16x32xbf16, #tpu.memory_space<vmem>>, vector<16x32xbf16>
    %c0_3 = arith.constant 0 : index
    %c0_4 = arith.constant 0 : index
    %2 = vector.load %arg3[%c0_3, %c0_4] : memref<1x32xf32, #tpu.memory_space<vmem>>, vector<1x32xf32>
    %c0_5 = arith.constant 0 : index
    %c0_6 = arith.constant 0 : index
    %3 = vector.load %arg4[%c0_5, %c0_6] : memref<1x32xf32, #tpu.memory_space<vmem>>, vector<1x32xf32>
    %cst = arith.constant dense<0.000000e+00> : vector<256x32xf32>
    %4 = tpu.matmul %0, %1, %cst {dimension_numbers = #tpu.dot_dimension_numbers<[1], [0], [0], [1], [0, 0, 1, 1], [], []>} : vector<256x16xbf16>, vector<16x32xbf16>, vector<256x32xf32> -> vector<256x32xf32>
    %5 = vector.broadcast %2 : vector<1x32xf32> to vector<256x32xf32>
    %6 = arith.mulf %4, %5 : vector<256x32xf32>
    %7 = vector.broadcast %3 : vector<1x32xf32> to vector<256x32xf32>
    %8 = arith.addf %6, %7 : vector<256x32xf32>
    %cst_7 = arith.constant 0.000000e+00 : f32
    %9 = vector.broadcast %cst_7 : f32 to vector<256x32xf32>
    %10 = arith.maximumf %8, %9 : vector<256x32xf32>
    %11 = arith.truncf %10 : vector<256x32xf32> to vector<256x32xbf16>
    %c0_8 = arith.constant 0 : index
    %c0_9 = arith.constant 0 : index
    %12 = vector.load %arg6[%c0_8, %c0_9] : memref<1x128xf32, #tpu.memory_space<vmem>>, vector<1x128xf32>
    %c0_10 = arith.constant 0 : index
    %c0_11 = arith.constant 0 : index
    %13 = vector.load %arg7[%c0_10, %c0_11] : memref<1x128xf32, #tpu.memory_space<vmem>>, vector<1x128xf32>
    %14 = vector.extract_strided_slice %11 {offsets = [0, 0], sizes = [16, 32], strides = [1, 1]} : vector<256x32xbf16> to vector<16x32xbf16>
    %c0_12 = arith.constant 0 : index
    %c0_13 = arith.constant 0 : index
    %c0_14 = arith.constant 0 : index
    %15 = vector.load %arg5[%c0_12, %c0_13, %c0_14] : memref<16x32x128xbf16, #tpu.memory_space<vmem>>, vector<1x32x128xbf16>
    %16 = vector.shape_cast %15 : vector<1x32x128xbf16> to vector<32x128xbf16>
    %cst_15 = arith.constant dense<0.000000e+00> : vector<16x128xf32>
    %17 = tpu.matmul %14, %16, %cst_15 {dimension_numbers = #tpu.dot_dimension_numbers<[1], [0], [0], [1], [0, 0, 1, 1], [], []>} : vector<16x32xbf16>, vector<32x128xbf16>, vector<16x128xf32> -> vector<16x128xf32>
    %18 = vector.extract_strided_slice %11 {offsets = [16, 0], sizes = [16, 32], strides = [1, 1]} : vector<256x32xbf16> to vector<16x32xbf16>
    %c1 = arith.constant 1 : index
    %c0_16 = arith.constant 0 : index
    %c0_17 = arith.constant 0 : index
    %19 = vector.load %arg5[%c1, %c0_16, %c0_17] : memref<16x32x128xbf16, #tpu.memory_space<vmem>>, vector<1x32x128xbf16>
    %20 = vector.shape_cast %19 : vector<1x32x128xbf16> to vector<32x128xbf16>
    %cst_18 = arith.constant dense<0.000000e+00> : vector<16x128xf32>
    %21 = tpu.matmul %18, %20, %cst_18 {dimension_numbers = #tpu.dot_dimension_numbers<[1], [0], [0], [1], [0, 0, 1, 1], [], []>} : vector<16x32xbf16>, vector<32x128xbf16>, vector<16x128xf32> -> vector<16x128xf32>
    %22 = arith.addf %17, %21 : vector<16x128xf32>
    %23 = vector.extract_strided_slice %11 {offsets = [32, 0], sizes = [16, 32], strides = [1, 1]} : vector<256x32xbf16> to vector<16x32xbf16>
    %c2 = arith.constant 2 : index
    %c0_19 = arith.constant 0 : index
    %c0_20 = arith.constant 0 : index
    %24 = vector.load %arg5[%c2, %c0_19, %c0_20] : memref<16x32x128xbf16, #tpu.memory_space<vmem>>, vector<1x32x128xbf16>
    %25 = vector.shape_cast %24 : vector<1x32x128xbf16> to vector<32x128xbf16>
    %cst_21 = arith.constant dense<0.000000e+00> : vector<16x128xf32>
    %26 = tpu.matmul %23, %25, %cst_21 {dimension_numbers = #tpu.dot_dimension_numbers<[1], [0], [0], [1], [0, 0, 1, 1], [], []>} : vector<16x32xbf16>, vector<32x128xbf16>, vector<16x128xf32> -> vector<16x128xf32>
    %27 = arith.addf %22, %26 : vector<16x128xf32>
    %28 = vector.extract_strided_slice %11 {offsets = [48, 0], sizes = [16, 32], strides = [1, 1]} : vector<256x32xbf16> to vector<16x32xbf16>
    %c3 = arith.constant 3 : index
    %c0_22 = arith.constant 0 : index
    %c0_23 = arith.constant 0 : index
    %29 = vector.load %arg5[%c3, %c0_22, %c0_23] : memref<16x32x128xbf16, #tpu.memory_space<vmem>>, vector<1x32x128xbf16>
    %30 = vector.shape_cast %29 : vector<1x32x128xbf16> to vector<32x128xbf16>
    %cst_24 = arith.constant dense<0.000000e+00> : vector<16x128xf32>
    %31 = tpu.matmul %28, %30, %cst_24 {dimension_numbers = #tpu.dot_dimension_numbers<[1], [0], [0], [1], [0, 0, 1, 1], [], []>} : vector<16x32xbf16>, vector<32x128xbf16>, vector<16x128xf32> -> vector<16x128xf32>
    %32 = arith.addf %27, %31 : vector<16x128xf32>
    %33 = vector.extract_strided_slice %11 {offsets = [64, 0], sizes = [16, 32], strides = [1, 1]} : vector<256x32xbf16> to vector<16x32xbf16>
    %c4 = arith.constant 4 : index
    %c0_25 = arith.constant 0 : index
    %c0_26 = arith.constant 0 : index
    %34 = vector.load %arg5[%c4, %c0_25, %c0_26] : memref<16x32x128xbf16, #tpu.memory_space<vmem>>, vector<1x32x128xbf16>
    %35 = vector.shape_cast %34 : vector<1x32x128xbf16> to vector<32x128xbf16>
    %cst_27 = arith.constant dense<0.000000e+00> : vector<16x128xf32>
    %36 = tpu.matmul %33, %35, %cst_27 {dimension_numbers = #tpu.dot_dimension_numbers<[1], [0], [0], [1], [0, 0, 1, 1], [], []>} : vector<16x32xbf16>, vector<32x128xbf16>, vector<16x128xf32> -> vector<16x128xf32>
    %37 = arith.addf %32, %36 : vector<16x128xf32>
    %38 = vector.extract_strided_slice %11 {offsets = [80, 0], sizes = [16, 32], strides = [1, 1]} : vector<256x32xbf16> to vector<16x32xbf16>
    %c5 = arith.constant 5 : index
    %c0_28 = arith.constant 0 : index
    %c0_29 = arith.constant 0 : index
    %39 = vector.load %arg5[%c5, %c0_28, %c0_29] : memref<16x32x128xbf16, #tpu.memory_space<vmem>>, vector<1x32x128xbf16>
    %40 = vector.shape_cast %39 : vector<1x32x128xbf16> to vector<32x128xbf16>
    %cst_30 = arith.constant dense<0.000000e+00> : vector<16x128xf32>
    %41 = tpu.matmul %38, %40, %cst_30 {dimension_numbers = #tpu.dot_dimension_numbers<[1], [0], [0], [1], [0, 0, 1, 1], [], []>} : vector<16x32xbf16>, vector<32x128xbf16>, vector<16x128xf32> -> vector<16x128xf32>
    %42 = arith.addf %37, %41 : vector<16x128xf32>
    %43 = vector.extract_strided_slice %11 {offsets = [96, 0], sizes = [16, 32], strides = [1, 1]} : vector<256x32xbf16> to vector<16x32xbf16>
    %c6 = arith.constant 6 : index
    %c0_31 = arith.constant 0 : index
    %c0_32 = arith.constant 0 : index
    %44 = vector.load %arg5[%c6, %c0_31, %c0_32] : memref<16x32x128xbf16, #tpu.memory_space<vmem>>, vector<1x32x128xbf16>
    %45 = vector.shape_cast %44 : vector<1x32x128xbf16> to vector<32x128xbf16>
    %cst_33 = arith.constant dense<0.000000e+00> : vector<16x128xf32>
    %46 = tpu.matmul %43, %45, %cst_33 {dimension_numbers = #tpu.dot_dimension_numbers<[1], [0], [0], [1], [0, 0, 1, 1], [], []>} : vector<16x32xbf16>, vector<32x128xbf16>, vector<16x128xf32> -> vector<16x128xf32>
    %47 = arith.addf %42, %46 : vector<16x128xf32>
    %48 = vector.extract_strided_slice %11 {offsets = [112, 0], sizes = [16, 32], strides = [1, 1]} : vector<256x32xbf16> to vector<16x32xbf16>
    %c7 = arith.constant 7 : index
    %c0_34 = arith.constant 0 : index
    %c0_35 = arith.constant 0 : index
    %49 = vector.load %arg5[%c7, %c0_34, %c0_35] : memref<16x32x128xbf16, #tpu.memory_space<vmem>>, vector<1x32x128xbf16>
    %50 = vector.shape_cast %49 : vector<1x32x128xbf16> to vector<32x128xbf16>
    %cst_36 = arith.constant dense<0.000000e+00> : vector<16x128xf32>
    %51 = tpu.matmul %48, %50, %cst_36 {dimension_numbers = #tpu.dot_dimension_numbers<[1], [0], [0], [1], [0, 0, 1, 1], [], []>} : vector<16x32xbf16>, vector<32x128xbf16>, vector<16x128xf32> -> vector<16x128xf32>
    %52 = arith.addf %47, %51 : vector<16x128xf32>
    %53 = vector.extract_strided_slice %11 {offsets = [128, 0], sizes = [16, 32], strides = [1, 1]} : vector<256x32xbf16> to vector<16x32xbf16>
    %c8 = arith.constant 8 : index
    %c0_37 = arith.constant 0 : index
    %c0_38 = arith.constant 0 : index
    %54 = vector.load %arg5[%c8, %c0_37, %c0_38] : memref<16x32x128xbf16, #tpu.memory_space<vmem>>, vector<1x32x128xbf16>
    %55 = vector.shape_cast %54 : vector<1x32x128xbf16> to vector<32x128xbf16>
    %cst_39 = arith.constant dense<0.000000e+00> : vector<16x128xf32>
    %56 = tpu.matmul %53, %55, %cst_39 {dimension_numbers = #tpu.dot_dimension_numbers<[1], [0], [0], [1], [0, 0, 1, 1], [], []>} : vector<16x32xbf16>, vector<32x128xbf16>, vector<16x128xf32> -> vector<16x128xf32>
    %57 = arith.addf %52, %56 : vector<16x128xf32>
    %58 = vector.extract_strided_slice %11 {offsets = [144, 0], sizes = [16, 32], strides = [1, 1]} : vector<256x32xbf16> to vector<16x32xbf16>
    %c9 = arith.constant 9 : index
    %c0_40 = arith.constant 0 : index
    %c0_41 = arith.constant 0 : index
    %59 = vector.load %arg5[%c9, %c0_40, %c0_41] : memref<16x32x128xbf16, #tpu.memory_space<vmem>>, vector<1x32x128xbf16>
    %60 = vector.shape_cast %59 : vector<1x32x128xbf16> to vector<32x128xbf16>
    %cst_42 = arith.constant dense<0.000000e+00> : vector<16x128xf32>
    %61 = tpu.matmul %58, %60, %cst_42 {dimension_numbers = #tpu.dot_dimension_numbers<[1], [0], [0], [1], [0, 0, 1, 1], [], []>} : vector<16x32xbf16>, vector<32x128xbf16>, vector<16x128xf32> -> vector<16x128xf32>
    %62 = arith.addf %57, %61 : vector<16x128xf32>
    %63 = vector.extract_strided_slice %11 {offsets = [160, 0], sizes = [16, 32], strides = [1, 1]} : vector<256x32xbf16> to vector<16x32xbf16>
    %c10 = arith.constant 10 : index
    %c0_43 = arith.constant 0 : index
    %c0_44 = arith.constant 0 : index
    %64 = vector.load %arg5[%c10, %c0_43, %c0_44] : memref<16x32x128xbf16, #tpu.memory_space<vmem>>, vector<1x32x128xbf16>
    %65 = vector.shape_cast %64 : vector<1x32x128xbf16> to vector<32x128xbf16>
    %cst_45 = arith.constant dense<0.000000e+00> : vector<16x128xf32>
    %66 = tpu.matmul %63, %65, %cst_45 {dimension_numbers = #tpu.dot_dimension_numbers<[1], [0], [0], [1], [0, 0, 1, 1], [], []>} : vector<16x32xbf16>, vector<32x128xbf16>, vector<16x128xf32> -> vector<16x128xf32>
    %67 = arith.addf %62, %66 : vector<16x128xf32>
    %68 = vector.extract_strided_slice %11 {offsets = [176, 0], sizes = [16, 32], strides = [1, 1]} : vector<256x32xbf16> to vector<16x32xbf16>
    %c11 = arith.constant 11 : index
    %c0_46 = arith.constant 0 : index
    %c0_47 = arith.constant 0 : index
    %69 = vector.load %arg5[%c11, %c0_46, %c0_47] : memref<16x32x128xbf16, #tpu.memory_space<vmem>>, vector<1x32x128xbf16>
    %70 = vector.shape_cast %69 : vector<1x32x128xbf16> to vector<32x128xbf16>
    %cst_48 = arith.constant dense<0.000000e+00> : vector<16x128xf32>
    %71 = tpu.matmul %68, %70, %cst_48 {dimension_numbers = #tpu.dot_dimension_numbers<[1], [0], [0], [1], [0, 0, 1, 1], [], []>} : vector<16x32xbf16>, vector<32x128xbf16>, vector<16x128xf32> -> vector<16x128xf32>
    %72 = arith.addf %67, %71 : vector<16x128xf32>
    %73 = vector.extract_strided_slice %11 {offsets = [192, 0], sizes = [16, 32], strides = [1, 1]} : vector<256x32xbf16> to vector<16x32xbf16>
    %c12 = arith.constant 12 : index
    %c0_49 = arith.constant 0 : index
    %c0_50 = arith.constant 0 : index
    %74 = vector.load %arg5[%c12, %c0_49, %c0_50] : memref<16x32x128xbf16, #tpu.memory_space<vmem>>, vector<1x32x128xbf16>
    %75 = vector.shape_cast %74 : vector<1x32x128xbf16> to vector<32x128xbf16>
    %cst_51 = arith.constant dense<0.000000e+00> : vector<16x128xf32>
    %76 = tpu.matmul %73, %75, %cst_51 {dimension_numbers = #tpu.dot_dimension_numbers<[1], [0], [0], [1], [0, 0, 1, 1], [], []>} : vector<16x32xbf16>, vector<32x128xbf16>, vector<16x128xf32> -> vector<16x128xf32>
    %77 = arith.addf %72, %76 : vector<16x128xf32>
    %78 = vector.extract_strided_slice %11 {offsets = [208, 0], sizes = [16, 32], strides = [1, 1]} : vector<256x32xbf16> to vector<16x32xbf16>
    %c13 = arith.constant 13 : index
    %c0_52 = arith.constant 0 : index
    %c0_53 = arith.constant 0 : index
    %79 = vector.load %arg5[%c13, %c0_52, %c0_53] : memref<16x32x128xbf16, #tpu.memory_space<vmem>>, vector<1x32x128xbf16>
    %80 = vector.shape_cast %79 : vector<1x32x128xbf16> to vector<32x128xbf16>
    %cst_54 = arith.constant dense<0.000000e+00> : vector<16x128xf32>
    %81 = tpu.matmul %78, %80, %cst_54 {dimension_numbers = #tpu.dot_dimension_numbers<[1], [0], [0], [1], [0, 0, 1, 1], [], []>} : vector<16x32xbf16>, vector<32x128xbf16>, vector<16x128xf32> -> vector<16x128xf32>
    %82 = arith.addf %77, %81 : vector<16x128xf32>
    %83 = vector.extract_strided_slice %11 {offsets = [224, 0], sizes = [16, 32], strides = [1, 1]} : vector<256x32xbf16> to vector<16x32xbf16>
    %c14 = arith.constant 14 : index
    %c0_55 = arith.constant 0 : index
    %c0_56 = arith.constant 0 : index
    %84 = vector.load %arg5[%c14, %c0_55, %c0_56] : memref<16x32x128xbf16, #tpu.memory_space<vmem>>, vector<1x32x128xbf16>
    %85 = vector.shape_cast %84 : vector<1x32x128xbf16> to vector<32x128xbf16>
    %cst_57 = arith.constant dense<0.000000e+00> : vector<16x128xf32>
    %86 = tpu.matmul %83, %85, %cst_57 {dimension_numbers = #tpu.dot_dimension_numbers<[1], [0], [0], [1], [0, 0, 1, 1], [], []>} : vector<16x32xbf16>, vector<32x128xbf16>, vector<16x128xf32> -> vector<16x128xf32>
    %87 = arith.addf %82, %86 : vector<16x128xf32>
    %88 = vector.extract_strided_slice %11 {offsets = [240, 0], sizes = [16, 32], strides = [1, 1]} : vector<256x32xbf16> to vector<16x32xbf16>
    %c15 = arith.constant 15 : index
    %c0_58 = arith.constant 0 : index
    %c0_59 = arith.constant 0 : index
    %89 = vector.load %arg5[%c15, %c0_58, %c0_59] : memref<16x32x128xbf16, #tpu.memory_space<vmem>>, vector<1x32x128xbf16>
    %90 = vector.shape_cast %89 : vector<1x32x128xbf16> to vector<32x128xbf16>
    %cst_60 = arith.constant dense<0.000000e+00> : vector<16x128xf32>
    %91 = tpu.matmul %88, %90, %cst_60 {dimension_numbers = #tpu.dot_dimension_numbers<[1], [0], [0], [1], [0, 0, 1, 1], [], []>} : vector<16x32xbf16>, vector<32x128xbf16>, vector<16x128xf32> -> vector<16x128xf32>
    %92 = arith.addf %87, %91 : vector<16x128xf32>
    %93 = vector.broadcast %12 : vector<1x128xf32> to vector<16x128xf32>
    %94 = arith.mulf %92, %93 : vector<16x128xf32>
    %95 = vector.broadcast %13 : vector<1x128xf32> to vector<16x128xf32>
    %96 = arith.addf %94, %95 : vector<16x128xf32>
    %c0_61 = arith.constant 0 : index
    %c0_62 = arith.constant 0 : index
    %97 = vector.load %arg8[%c0_61, %c0_62] : memref<16x128xf32, #tpu.memory_space<vmem>>, vector<16x128xf32>
    tpu.vector_store %arg8[%c0_61, %c0_62], %96 {strides = array<i32>} : memref<16x128xf32, #tpu.memory_space<vmem>>, vector<16x128xf32>,
    return
  }
  func.func @transform_0(%arg0: i32) -> (i32, i32) {
    %c0_i32 = arith.constant 0 : i32
    %c0_i32_0 = arith.constant 0 : i32
    return %arg0, %c0_i32 : i32, i32
  }
  func.func @transform_1(%arg0: i32) -> (i32, i32) {
    %c0_i32 = arith.constant 0 : i32
    %c0_i32_0 = arith.constant 0 : i32
    %c0_i32_1 = arith.constant 0 : i32
    return %c0_i32, %c0_i32_0 : i32, i32
  }
  func.func @transform_2(%arg0: i32) -> (i32, i32) {
    %c0_i32 = arith.constant 0 : i32
    %c0_i32_0 = arith.constant 0 : i32
    %c0_i32_1 = arith.constant 0 : i32
    return %c0_i32, %c0_i32_0 : i32, i32
  }
  func.func @transform_3(%arg0: i32) -> (i32, i32) {
    %c0_i32 = arith.constant 0 : i32
    %c0_i32_0 = arith.constant 0 : i32
    %c0_i32_1 = arith.constant 0 : i32
    return %c0_i32, %c0_i32_0 : i32, i32
  }
  func.func @transform_4(%arg0: i32) -> (i32, i32, i32) {
    %c0_i32 = arith.constant 0 : i32
    %c0_i32_0 = arith.constant 0 : i32
    %c0_i32_1 = arith.constant 0 : i32
    %c0_i32_2 = arith.constant 0 : i32
    return %c0_i32, %c0_i32_0, %c0_i32_1 : i32, i32, i32
  }
  func.func @transform_5(%arg0: i32) -> (i32, i32) {
    %c0_i32 = arith.constant 0 : i32
    %c0_i32_0 = arith.constant 0 : i32
    %c0_i32_1 = arith.constant 0 : i32
    return %c0_i32, %c0_i32_0 : i32, i32
  }
  func.func @transform_6(%arg0: i32) -> (i32, i32) {
    %c0_i32 = arith.constant 0 : i32
    %c0_i32_0 = arith.constant 0 : i32
    %c0_i32_1 = arith.constant 0 : i32
    return %c0_i32, %c0_i32_0 : i32, i32
  }
  func.func @transform_7(%arg0: i32) -> (i32, i32) {
    %c0_i32 = arith.constant 0 : i32
    %c0_i32_0 = arith.constant 0 : i32
    return %arg0, %c0_i32 : i32, i32
  }
}

</mosaic_0001>

<bundles_post_ra>
// kernel: tpu_custom_call.1
= control target key start
LH: loop header
LB: loop body
LE: loop exit
PB: predicated region body
PF: predicated region fallthrough
CT: control target
= control target key end

     0   :  { %12 = vsyncpa [#allocation3], 0  ;;  %s1692_s0 = inlined_call_operand.vmem [shape: bf16[256,16], index: 0, kind: input, shape index: {}]   ;;  %s1693_s1 = inlined_call_operand.vmem [shape: bf16[16,32], index: 1, kind: input, shape index: {}]   ;;  %s1694_s2 = inlined_call_operand.vmem [shape: f32[1,32], index: 2, kind: input, shape index: {}]   ;;  %s1695_s3 = inlined_call_operand.vmem [shape: f32[1,32], index: 3, kind: input, shape index: {}]   ;;  %s1696_s4 = inlined_call_operand.hbm [shape: bf16[16,32,128], index: 4, kind: input, shape index: {}]   ;;  %s1697_s5 = inlined_call_operand.vmem [shape: f32[1,128], index: 5, kind: input, shape index: {}]   ;;  %s1698_s6 = inlined_call_operand.vmem [shape: f32[1,128], index: 6, kind: input, shape index: {}]   ;;  %s1699_s7 = inlined_call_operand.hbm [shape: f32[16,128], index: 7, kind: output, shape index: {}]  }
   0x1   :  { %13 = vsyncpa [#allocation4], 0  ;;  %s26_s26 = sshll.u32 %s1696_s4, 4  ;;  %s1465_s27 = smov [#allocation2]   ;;  %s27_s26 = int_to_ptr.hbm [resolvable:$true] %s26_s26 }
   0x2   :  { %s28_s28 = sshll.u32 %s1465_s27, 4  ;;  %s1466_s29 = smov 64   ;;  %s29_s28 = int_to_ptr.vmem [resolvable:$true] %s28_s28 }
   0x3   :  { %s1467_s30 = smov 4  }
   0x4   :  { %34 = dma.hbm_to_vmem [thread:$0]  %s27_s26, 4096, %s29_s28, [#allocation3], %s1466_s29, %s1466_s29, %s1467_s30  }
   0x5   :  { %1461 = dma.done.wait [#allocation3], 4096  }
   0x6   :  { %1462 = vsyncadd [#allocation3], 4294963200  ;;  %v1367_v0 = vld [vmem:[%s1693_s1] sm:$0xff]  ;;  %vm166_vm0 = vcmask 130048   ;;  %v1352_v2 = vld [vmem:[%s1692_s0 + $0x8] sm:$0xff]  ;;  %vm466_vm1 = vcmask 261120  }
   0x7   :  { %v1351_v1 = vld [vmem:[%s1692_s0] sm:$0xff]  ;;  %222 = vmatpush.bf16.msra.mxu0 %v1367_v0  ;;  %1401 = vmatpush.bf16.msra.mxu2 %v1367_v0  ;;  %v1353_v3 = vld [vmem:[%s1692_s0 + $0x10] sm:$0xff]  ;;  %v1354_v4 = vld [vmem:[%s1692_s0 + $0x18] sm:$0xff]  ;;  %s1468_s20 = smov [#allocation5]   ;;  %s1470_s24 = smov 8  }
   0x8   :  { %1400 = vmatpush.bf16.msra.mxu1 %v1367_v0  ;;  %1402 = vmatpush.bf16.msra.mxu3 %v1367_v0  ;;  %v1361_v5 = vld [vmem:[%s1692_s0 + $0x50] sm:$0xff]  ;;  %v1355_v6 = vld [vmem:[%s1692_s0 + $0x20] sm:$0xff]  ;;  %v1362_v8 = vld [vmem:[%s1692_s0 + $0x58] sm:$0xff]  ;;  %s1108_s21 = sshll.u32 %s1468_s20, 4  ;;  %s1109_s21 = int_to_ptr.vmem [resolvable:$true] %s1108_s21 }
   0x9   :  { %v1359_v7 = vld [vmem:[%s1692_s0 + $0x40] sm:$0xff]  ;;  %v1364_v9 = vld [vmem:[%s1692_s0 + $0x68] sm:$0xff]  ;;  %v1365_v13 = vld [vmem:[%s1692_s0 + $0x70] sm:$0xff] }
   0xa   :  { %1191 = vmatmul.msk.bf16.vlgmr.msra.gmra.mxu0 %vm166_vm0, %v1351_v1  ;;  %1201 = vmatmul.msk.bf16.vlgmr.msra.gmra.mxu2 %vm166_vm0, %v1361_v5  ;;  %v1356_v10 = vld [vmem:[%s1692_s0 + $0x28] sm:$0xff]  ;;  %v1363_v12 = vld [vmem:[%s1692_s0 + $0x60] sm:$0xff]  ;;  %v1357_v14 = vld [vmem:[%s1692_s0 + $0x30] sm:$0xff] }
   0xb   :  { %1199 = vmatmul.msk.bf16.vlgmr.msra.gmra.mxu1 %vm166_vm0, %v1359_v7  ;;  %1204 = vmatmul.msk.bf16.vlgmr.msra.gmra.mxu3 %vm166_vm0, %v1364_v9  ;;  %v1360_v11 = vld [vmem:[%s1692_s0 + $0x48] sm:$0xff]  ;;  %v1366_v15 = vld [vmem:[%s1692_s0 + $0x78] sm:$0xff]  ;;  %v1368_v18 = vld [vmem:[#allocation2] sm:$0xff] }
   0xc   :  { %v1369_v16 = vld [vmem:[#allocation2 + $0x8] sm:$0xff]  ;;  %v1358_v17 = vld [vmem:[%s1692_s0 + $0x38] sm:$0xff]  ;;  %v1584_v20 = vld [vmem:[%s1694_s2] ss:$0 sm:$0xff] }
   0xd   :  { %510 = vmatpush.bf16.msrb.mxu2 %v1369_v16  ;;  %v1371_v19 = vld [vmem:[#allocation2 + $0x18] sm:$0xff]  ;;  %v1370_v22 = vld [vmem:[#allocation2 + $0x10] sm:$0xff]  ;;  %v1590_v24 = vld [vmem:[%s1695_s3] ss:$0 sm:$0xff] }
   0xe   :  { %476 = vmatpush.bf16.msrb.mxu1 %v1371_v19  ;;  %v1373_v30 = vld [vmem:[#allocation2 + $0x28] sm:$0xff]  ;;  %v1372_v35 = vld [vmem:[#allocation2 + $0x20] sm:$0xff]  ;;  %v1375_v45 = vld [vmem:[#allocation2 + $0x38] sm:$0xff] }
   0xf   :  { %549 = vmatpush.bf16.msrb.mxu3 %v1373_v30  ;;  %v1374_v50 = vld [vmem:[#allocation2 + $0x30] sm:$0xff]  ;;  %v1377_v60 = vld [vmem:[#allocation2 + $0x48] sm:$0xff]  ;;  %v1376_v1 = vld [vmem:[#allocation2 + $0x40] sm:$0xff] }
  0x10   :  { %v1378_v16 = vld [vmem:[#allocation2 + $0x50] sm:$0xff]  ;;  %v1381_v30 = vld [vmem:[#allocation2 + $0x68] sm:$0xff] }
  0x11   :  { %511 = vmatpush.bf16.msrb.mxu2 %v1368_v18 }
  0x12   :  { %477 = vmatpush.bf16.msrb.mxu1 %v1370_v22 }
  0x13   :  { %550 = vmatpush.bf16.msrb.mxu3 %v1372_v35 }
  0x15   :  { %631 = vmatpush.bf16.msra.mxu2 %v1377_v60 }
  0x16   :  { %590 = vmatpush.bf16.msra.mxu1 %v1375_v45 }
  0x19   :  { %632 = vmatpush.bf16.msra.mxu2 %v1376_v1 }
  0x1a   :  { %1192 = vmatmul.msk.bf16.gmra.mxu0 %vm166_vm0, %v1352_v2  ;;  %1202 = vmatmul.msk.bf16.gmra.mxu2 %vm166_vm0, %v1362_v8 }
  0x1b   :  { %1200 = vmatmul.msk.bf16.gmra.mxu1 %vm166_vm0, %v1360_v11  ;;  %1205 = vmatmul.msk.bf16.gmra.mxu3 %vm166_vm0, %v1365_v13  ;;  %v1379_v11 = vld [vmem:[#allocation2 + $0x58] sm:$0xff] }
  0x1c   :  { %591 = vmatpush.bf16.msra.mxu1 %v1374_v50  ;;  %672 = vmatpush.bf16.msra.mxu3 %v1379_v11  ;;  %v1390_v11 = vld [vmem:[#allocation2 + $0xb0] sm:$0xff] }
  0x20   :  { %673 = vmatpush.bf16.msra.mxu3 %v1378_v16 }
  0x2a   :  { %1193 = vmatmul.msk.bf16.gmra.mxu0 %vm166_vm0, %v1353_v3  ;;  %1203 = vmatmul.msk.bf16.gmra.mxu2 %vm166_vm0, %v1363_v12 }
  0x2b   :  { %1206 = vmatmul.msk.bf16.gmra.mxu3 %vm166_vm0, %v1366_v15 }
  0x3a   :  { %1194 = vmatmul.msk.bf16.gmra.mxu0 %vm166_vm0, %v1354_v4 }
  0x4a   :  { %1195 = vmatmul.msk.bf16.gmra.mxu0 %vm166_vm0, %v1355_v6 }
  0x5a   :  { %1196 = vmatmul.msk.bf16.gmra.mxu0 %vm166_vm0, %v1356_v10 }
  0x6a   :  { %1197 = vmatmul.msk.bf16.gmra.mxu0 %vm166_vm0, %v1357_v14 }
  0x7a   :  { %1198 = vmatmul.msk.bf16.gmra.mxu0 %vm166_vm0, %v1358_v17 }
  0x87   :  { %v224_v21 = vpop.f32.mrf.mxu0 }
  0x88   :  { %v307_v23 = vmul.f32 %v1584_v20, %v224_v21 }
  0x8a   :  { %v342_v25 = vadd.f32 %v1590_v24, %v307_v23 }
  0x8c   :  { %v374_v27 = vmax.f32 %v342_v25, 0.0 }
  0x8d   :  { %v1613_v25 = vpop.f32.mrf.mxu2 }
  0x8e   :  { %v406_v31 = vpack.c.bf16 %v374_v27, %v374_v27 }
  0x8f   :  { %v226_v26 = vpop.f32.mrf.mxu0 }
  0x90   :  { %v308_v28 = vmul.f32 %v1584_v20, %v226_v26  ;;  %v486_v36 = vunpack.c.l.b16 %v406_v31  ;;  %v1385_v31 = vld [vmem:[#allocation2 + $0x88] sm:$0xff] }
  0x92   :  { %v343_v29 = vadd.f32 %v1590_v24, %v308_v28 }
  0x94   :  { %v375_v32 = vmax.f32 %v343_v29, 0.0  ;;  %v264_v29 = vpop.f32.mrf.mxu1 }
  0x96   :  { %v407_v33 = vpack.c.bf16 %v375_v32, %v375_v32 }
  0x97   :  { %v229_v34 = vpop.f32.mrf.mxu0 }
  0x98   :  { %v487_v37 = vunpack.c.l.b16 %v407_v33  ;;  %v309_v38 = vmul.f32 %v1584_v20, %v229_v34 }
  0x9a   :  { %v488_v39 = vpack.c.b16 %v487_v37, %v486_v36  ;;  %v344_v40 = vadd.f32 %v1590_v24, %v309_v38  ;;  %v1380_v36 = vld [vmem:[#allocation2 + $0x60] sm:$0xff] }
  0x9b   :  { %v1384_v37 = vld [vmem:[#allocation2 + $0x80] sm:$0xff] }
  0x9c   :  { %1224 = vmatmul.msk.bf16.vlgmr.msrb.gmra.mxu2 %vm466_vm1, %v488_v39  ;;  %v376_v42 = vmax.f32 %v344_v40, 0.0 }
  0x9e   :  { %v408_v46 = vpack.c.bf16 %v376_v42, %v376_v42 }
  0x9f   :  { %v231_v41 = vpop.f32.mrf.mxu0 }
  0xa0   :  { %v310_v43 = vmul.f32 %v1584_v20, %v231_v41  ;;  %v451_v51 = vunpack.c.l.b16 %v408_v46  ;;  %v1618_v41 = vpop.f32.mrf.mxu2  ;;  %v1622_v46 = vpop.f32.mrf.mxu3 }
  0xa2   :  { %v345_v44 = vadd.f32 %v1590_v24, %v310_v43 }
  0xa4   :  { %v377_v47 = vmax.f32 %v345_v44, 0.0  ;;  %v266_v44 = vpop.f32.mrf.mxu1 }
  0xa6   :  { %v409_v48 = vpack.c.bf16 %v377_v47, %v377_v47 }
  0xa7   :  { %v234_v49 = vpop.f32.mrf.mxu0 }
  0xa8   :  { %v452_v52 = vunpack.c.l.b16 %v409_v48  ;;  %v311_v53 = vmul.f32 %v1584_v20, %v234_v49  ;;  %v1383_v49 = vld [vmem:[#allocation2 + $0x78] sm:$0xff] }
  0xa9   :  { %754 = vmatpush.bf16.msrb.mxu2 %v1383_v49 }
  0xaa   :  { %v453_v54 = vpack.c.b16 %v452_v52, %v451_v51  ;;  %v346_v55 = vadd.f32 %v1590_v24, %v311_v53  ;;  %v323_v51 = vmul.f32 %v1584_v20, %v264_v29  ;;  %v279_v52 = vpop.f32.mrf.mxu2  ;;  %v1387_v53 = vld [vmem:[#allocation2 + $0x98] sm:$0xff] }
  0xac   :  { %1215 = vmatmul.msk.bf16.vlgmr.msrb.gmra.mxu1 %vm466_vm1, %v453_v54  ;;  %v378_v57 = vmax.f32 %v346_v55, 0.0  ;;  %v358_v60 = vadd.f32 %v1590_v24, %v323_v51 }
  0xad   :  { %713 = vmatpush.bf16.msrb.mxu1 %v1381_v30  ;;  %v329_v30 = vmul.f32 %v1584_v20, %v279_v52 }
  0xae   :  { %v410_v61 = vpack.c.bf16 %v378_v57, %v378_v57 }
  0xaf   :  { %v236_v56 = vpop.f32.mrf.mxu0 }
  0xb0   :  { %v312_v58 = vmul.f32 %v1584_v20, %v236_v56  ;;  %v525_v2 = vunpack.c.l.b16 %v410_v61  ;;  %v324_v56 = vmul.f32 %v1584_v20, %v266_v44  ;;  %v1382_v61 = vld [vmem:[#allocation2 + $0x70] sm:$0xff]  ;;  %v1393_v44 = vld [vmem:[#allocation2 + $0xc8] sm:$0xff] }
  0xb1   :  { %714 = vmatpush.bf16.msrb.mxu1 %v1380_v36  ;;  %755 = vmatpush.bf16.msrb.mxu2 %v1382_v61 }
  0xb2   :  { %v347_v59 = vadd.f32 %v1590_v24, %v312_v58  ;;  %v269_v58 = vpop.f32.mrf.mxu1 }
  0xb4   :  { %v379_v62 = vmax.f32 %v347_v59, 0.0 }
  0xb6   :  { %v411_v63 = vpack.c.bf16 %v379_v62, %v379_v62  ;;  %v1386_v62 = vld [vmem:[#allocation2 + $0x90] sm:$0xff] }
  0xb7   :  { %v239_v0 = vpop.f32.mrf.mxu0 }
  0xb8   :  { %v526_v3 = vunpack.c.l.b16 %v411_v63  ;;  %v313_v4 = vmul.f32 %v1584_v20, %v239_v0 }
  0xba   :  { %v527_v5 = vpack.c.b16 %v526_v3, %v525_v2  ;;  %v348_v6 = vadd.f32 %v1590_v24, %v313_v4  ;;  %v359_v2 = vadd.f32 %v1590_v24, %v324_v56  ;;  %v1631_v3 = vpop.f32.mrf.mxu3  ;;  %v1391_v4 = vld [vmem:[#allocation2 + $0xb8] sm:$0xff] }
  0xbc   :  { %1233 = vmatmul.msk.bf16.vlgmr.msrb.gmra.mxu3 %vm466_vm1, %v527_v5  ;;  %v380_v8 = vmax.f32 %v348_v6, 0.0 }
  0xbd   :  { %795 = vmatpush.bf16.msrb.mxu3 %v1385_v31 }
  0xbe   :  { %v412_v12 = vpack.c.bf16 %v380_v8, %v380_v8  ;;  %v391_v8 = vmax.f32 %v359_v2, 0.0 }
  0xbf   :  { %v241_v7 = vpop.f32.mrf.mxu0 }
  0xc0   :  { %v314_v9 = vmul.f32 %v1584_v20, %v241_v7  ;;  %v566_v17 = vunpack.c.l.b16 %v412_v12  ;;  %v390_v7 = vmax.f32 %v358_v60, 0.0  ;;  %v1388_v12 = vld [vmem:[#allocation2 + $0xa0] sm:$0xff] }
  0xc1   :  { %796 = vmatpush.bf16.msrb.mxu3 %v1384_v37 }
  0xc2   :  { %v349_v10 = vadd.f32 %v1590_v24, %v314_v9  ;;  %v1389_v9 = vld [vmem:[#allocation2 + $0xa8] sm:$0xff] }
  0xc4   :  { %v381_v13 = vmax.f32 %v349_v10, 0.0  ;;  %v281_v10 = vpop.f32.mrf.mxu2 }
  0xc5   :  { %v330_v31 = vmul.f32 %v1584_v20, %v281_v10 }
  0xc6   :  { %v413_v14 = vpack.c.bf16 %v381_v13, %v381_v13 }
  0xc7   :  { %v244_v15 = vpop.f32.mrf.mxu0 }
  0xc8   :  { %v567_v18 = vunpack.c.l.b16 %v413_v14  ;;  %v315_v19 = vmul.f32 %v1584_v20, %v244_v15  ;;  %v422_v15 = vpack.c.bf16 %v390_v7, %v390_v7 }
  0xca   :  { %v568_v21 = vpack.c.b16 %v567_v18, %v566_v17  ;;  %v350_v22 = vadd.f32 %v1590_v24, %v315_v19  ;;  %v423_v17 = vpack.c.bf16 %v391_v8, %v391_v8  ;;  %v271_v18 = vpop.f32.mrf.mxu1 }
  0xcc   :  { %1242 = vmatmul.msk.bf16.vlgmr.msra.gmra.mxu1 %vm466_vm1, %v568_v21  ;;  %v382_v26 = vmax.f32 %v350_v22, 0.0  ;;  %v325_v21 = vmul.f32 %v1584_v20, %v269_v58  ;;  %v326_v22 = vmul.f32 %v1584_v20, %v271_v18  ;;  %v772_v29 = vunpack.c.l.b16 %v423_v17  ;;  %v284_v36 = vpop.f32.mrf.mxu2 }
  0xcd   :  { %836 = vmatpush.bf16.msra.mxu1 %v1387_v53 }
  0xce   :  { %v414_v32 = vpack.c.bf16 %v382_v26, %v382_v26 }
  0xcf   :  { %v246_v23 = vpop.f32.mrf.mxu0 }
  0xd0   :  { %v316_v27 = vmul.f32 %v1584_v20, %v246_v23  ;;  %v607_v38 = vunpack.c.l.b16 %v414_v32  ;;  %v294_v23 = vpop.f32.mrf.mxu3 }
  0xd1   :  { %837 = vmatpush.bf16.msra.mxu1 %v1386_v62  ;;  %v335_v10 = vmul.f32 %v1584_v20, %v294_v23 }
  0xd2   :  { %v351_v28 = vadd.f32 %v1590_v24, %v316_v27  ;;  %v771_v27 = vunpack.c.l.b16 %v422_v15 }
  0xd3   :  { %v370_v23 = vadd.f32 %v1590_v24, %v335_v10 }
  0xd4   :  { %v383_v33 = vmax.f32 %v351_v28, 0.0 }
  0xd6   :  { %v415_v34 = vpack.c.bf16 %v383_v33, %v383_v33 }
  0xd7   :  { %v249_v35 = vpop.f32.mrf.mxu0 }
  0xd8   :  { %v608_v39 = vunpack.c.l.b16 %v415_v34  ;;  %v317_v40 = vmul.f32 %v1584_v20, %v249_v35  ;;  %v360_v34 = vadd.f32 %v1590_v24, %v325_v21  ;;  %v361_v35 = vadd.f32 %v1590_v24, %v326_v22  ;;  %v296_v53 = vpop.f32.mrf.mxu3 }
  0xda   :  { %v609_v42 = vpack.c.b16 %v608_v39, %v607_v38  ;;  %v352_v43 = vadd.f32 %v1590_v24, %v317_v40  ;;  %v773_v39 = vpack.c.b16 %v772_v29, %v771_v27  ;;  %v393_v49 = vmax.f32 %v361_v35, 0.0  ;;  %v1395_v27 = vld [vmem:[#allocation2 + $0xd8] sm:$0xff] }
  0xdb   :  { %v1399_v29 = vld [vmem:[#allocation2 + $0xf8] sm:$0xff] }
  0xdc   :  { %1251 = vmatmul.msk.bf16.vlgmr.msra.gmra.mxu2 %vm466_vm1, %v609_v42  ;;  %v384_v47 = vmax.f32 %v352_v43, 0.0  ;;  %v364_v42 = vadd.f32 %v1590_v24, %v329_v30  ;;  %v365_v43 = vadd.f32 %v1590_v24, %v330_v31  ;;  %v425_v58 = vpack.c.bf16 %v393_v49, %v393_v49 }
  0xdd   :  { %877 = vmatpush.bf16.msra.mxu2 %v1389_v9 }
  0xde   :  { %v416_v54 = vpack.c.bf16 %v384_v47, %v384_v47  ;;  %v396_v51 = vmax.f32 %v364_v42, 0.0  ;;  %v397_v52 = vmax.f32 %v365_v43, 0.0  ;;  %v813_v2 = vunpack.c.l.b16 %v425_v58 }
  0xdf   :  { %v251_v45 = vpop.f32.mrf.mxu0 }
  0xe0   :  { %v318_v48 = vmul.f32 %v1584_v20, %v251_v45  ;;  %v648_v63 = vunpack.c.l.b16 %v416_v54  ;;  %v1397_v45 = vld [vmem:[#allocation2 + $0xe8] sm:$0xff]  ;;  %v1392_v54 = vld [vmem:[#allocation2 + $0xc0] sm:$0xff]  ;;  %v428_v61 = vpack.c.bf16 %v396_v51, %v396_v51  ;;  %v429_v62 = vpack.c.bf16 %v397_v52, %v397_v52 }
  0xe1   :  { %878 = vmatpush.bf16.msra.mxu2 %v1388_v12  ;;  %v327_v12 = vmul.f32 %v1584_v20, %v1613_v25 }
  0xe2   :  { %v353_v50 = vadd.f32 %v1590_v24, %v318_v48  ;;  %v392_v48 = vmax.f32 %v360_v34, 0.0  ;;  %v894_v8 = vunpack.c.l.b16 %v428_v61  ;;  %v895_v9 = vunpack.c.l.b16 %v429_v62  ;;  %v1394_v34 = vld [vmem:[#allocation2 + $0xd0] sm:$0xff] }
  0xe3   :  { %v362_v25 = vadd.f32 %v1590_v24, %v327_v12 }
  0xe4   :  { %v385_v55 = vmax.f32 %v353_v50, 0.0  ;;  %v424_v56 = vpack.c.bf16 %v392_v48, %v392_v48  ;;  %v896_v22 = vpack.c.b16 %v895_v9, %v894_v8 }
  0xe5   :  { %v394_v35 = vmax.f32 %v362_v25, 0.0 }
  0xe6   :  { %v417_v57 = vpack.c.bf16 %v385_v55, %v385_v55  ;;  %v1396_v55 = vld [vmem:[#allocation2 + $0xe0] sm:$0xff] }
  0xe7   :  { %v254_v59 = vpop.f32.mrf.mxu0 }
  0xe8   :  { %v649_v0 = vunpack.c.l.b16 %v417_v57  ;;  %v319_v1 = vmul.f32 %v1584_v20, %v254_v59 }
  0xea   :  { %v650_v5 = vpack.c.b16 %v649_v0, %v648_v63  ;;  %v354_v6 = vadd.f32 %v1590_v24, %v319_v1  ;;  %v286_v63 = vpop.f32.mrf.mxu2  ;;  %v812_v1 = vunpack.c.l.b16 %v424_v56  ;;  %v334_v56 = vmul.f32 %v1584_v20, %v1631_v3 }
  0xeb   :  { %v332_v7 = vmul.f32 %v1584_v20, %v286_v63 }
  0xec   :  { %1260 = vmatmul.msk.bf16.vlgmr.msra.gmra.mxu3 %vm466_vm1, %v650_v5  ;;  %v386_v14 = vmax.f32 %v354_v6, 0.0  ;;  %v331_v6 = vmul.f32 %v1584_v20, %v284_v36  ;;  %v814_v15 = vpack.c.b16 %v813_v2, %v812_v1  ;;  %v369_v63 = vadd.f32 %v1590_v24, %v334_v56 }
  0xed   :  { %918 = vmatpush.bf16.msra.mxu3 %v1391_v4  ;;  %v367_v21 = vadd.f32 %v1590_v24, %v332_v7 }
  0xee   :  { %v418_v26 = vpack.c.bf16 %v386_v14, %v386_v14  ;;  %v401_v3 = vmax.f32 %v369_v63, 0.0 }
  0xef   :  { %v256_v13 = vpop.f32.mrf.mxu0  ;;  %v399_v31 = vmax.f32 %v367_v21, 0.0 }
  0xf0   :  { %v320_v16 = vmul.f32 %v1584_v20, %v256_v13  ;;  %v689_v37 = vunpack.c.l.b16 %v418_v26  ;;  %v328_v13 = vmul.f32 %v1584_v20, %v1618_v41 }
  0xf1   :  { %919 = vmatpush.bf16.msra.mxu3 %v1390_v11  ;;  %v336_v11 = vmul.f32 %v1584_v20, %v296_v53 }
  0xf2   :  { %v355_v19 = vadd.f32 %v1590_v24, %v320_v16  ;;  %v299_v16 = vpop.f32.mrf.mxu3 }
  0xf3   :  { %v371_v26 = vadd.f32 %v1590_v24, %v336_v11  ;;  %v337_v49 = vmul.f32 %v1584_v20, %v299_v16 }
  0xf4   :  { %v387_v28 = vmax.f32 %v355_v19, 0.0  ;;  %v366_v19 = vadd.f32 %v1590_v24, %v331_v6 }
  0xf5   :  { %v372_v58 = vadd.f32 %v1590_v24, %v337_v49 }
  0xf6   :  { %v419_v32 = vpack.c.bf16 %v387_v28, %v387_v28  ;;  %v363_v28 = vadd.f32 %v1590_v24, %v328_v13  ;;  %v398_v30 = vmax.f32 %v366_v19, 0.0 }
  0xf7   :  { %v259_v33 = vpop.f32.mrf.mxu0 }
  0xf8   :  { %v690_v38 = vunpack.c.l.b16 %v419_v32  ;;  %v321_v40 = vmul.f32 %v1584_v20, %v259_v33  ;;  %v402_v32 = vmax.f32 %v370_v23, 0.0  ;;  %v403_v33 = vmax.f32 %v371_v26, 0.0 }
  0xf9   :  { %v395_v36 = vmax.f32 %v363_v28, 0.0 }
  0xfa   :  { %v691_v47 = vpack.c.b16 %v690_v38, %v689_v37  ;;  %v356_v50 = vadd.f32 %v1590_v24, %v321_v40  ;;  %v1398_v37 = vld [vmem:[#allocation2 + $0xf0] sm:$0xff]  ;;  %v430_v38 = vpack.c.bf16 %v398_v30, %v398_v30  ;;  %v434_v40 = vpack.c.bf16 %v402_v32, %v402_v32  ;;  %v301_v43 = vpop.f32.mrf.mxu3 }
  0xfb   :  { %v435_v42 = vpack.c.bf16 %v403_v33, %v403_v33 }
  0xfc   :  { %1269 = vmatmul.msk.bf16.vlgmr.msrb.gmra.mxu1 %vm466_vm1, %v691_v47  ;;  %1287 = vmatmul.msk.bf16.vlgmr.msrb.gmra.mxu3 %vm466_vm1, %v773_v39  ;;  %v388_v59 = vmax.f32 %v356_v50, 0.0  ;;  %v431_v39 = vpack.c.bf16 %v399_v31, %v399_v31  ;;  %v935_v47 = vunpack.c.l.b16 %v430_v38  ;;  %v338_v50 = vmul.f32 %v1584_v20, %v301_v43 }
  0xfd   :  { %959 = vmatpush.bf16.msrb.mxu1 %v1393_v44  ;;  %1041 = vmatpush.bf16.msrb.mxu3 %v1397_v45  ;;  %v426_v44 = vpack.c.bf16 %v394_v35, %v394_v35  ;;  %v427_v45 = vpack.c.bf16 %v395_v36, %v395_v36  ;;  %v1017_v51 = vunpack.c.l.b16 %v434_v40  ;;  %v1018_v52 = vunpack.c.l.b16 %v435_v42 }
  0xfe   :  { %v420_v4 = vpack.c.bf16 %v388_v59, %v388_v59  ;;  %v936_v48 = vunpack.c.l.b16 %v431_v39  ;;  %v373_v59 = vadd.f32 %v1590_v24, %v338_v50 }
  0xff   :  { %v261_v57 = vpop.f32.mrf.mxu0  ;;  %v853_v53 = vunpack.c.l.b16 %v426_v44 }
 0x100   :  { %v322_v60 = vmul.f32 %v1584_v20, %v261_v57  ;;  %v730_v17 = vunpack.c.l.b16 %v420_v4  ;;  %v937_v57 = vpack.c.b16 %v936_v48, %v935_v47 }
 0x101   :  { %960 = vmatpush.bf16.msrb.mxu1 %v1392_v54  ;;  %1042 = vmatpush.bf16.msrb.mxu3 %v1396_v55  ;;  %v854_v54 = vunpack.c.l.b16 %v427_v45  ;;  %v333_v55 = vmul.f32 %v1584_v20, %v1622_v46  ;;  %v405_v46 = vmax.f32 %v373_v59, 0.0 }
 0x102   :  { %v357_v0 = vadd.f32 %v1590_v24, %v322_v60  ;;  %v1019_v60 = vpack.c.b16 %v1018_v52, %v1017_v51 }
 0x103   :  { %v855_v61 = vpack.c.b16 %v854_v54, %v853_v53  ;;  %v368_v62 = vadd.f32 %v1590_v24, %v333_v55  ;;  %v437_v2 = vpack.c.bf16 %v405_v46, %v405_v46 }
 0x104   :  { %v389_v5 = vmax.f32 %v357_v0, 0.0  ;;  %v404_v0 = vmax.f32 %v372_v58, 0.0 }
 0x105   :  { %v400_v20 = vmax.f32 %v368_v62, 0.0  ;;  %v1059_v7 = vunpack.c.l.b16 %v437_v2 }
 0x106   :  { %v421_v14 = vpack.c.bf16 %v389_v5, %v389_v5  ;;  %v436_v1 = vpack.c.bf16 %v404_v0, %v404_v0  ;;  %v433_v5 = vpack.c.bf16 %v401_v3, %v401_v3 }
 0x107   :  { %v432_v4 = vpack.c.bf16 %v400_v20, %v400_v20 }
 0x108   :  { %v731_v18 = vunpack.c.l.b16 %v421_v14  ;;  %v1058_v6 = vunpack.c.l.b16 %v436_v1  ;;  %v977_v9 = vunpack.c.l.b16 %v433_v5  ;;  %v1411_v1 = vld [vmem:[%s1697_s5] ss:$0 sm:$0xff]  ;;  %s1110_s5 = sshll.u32 %s1699_s7, 4  ;;  %s1111_s5 = int_to_ptr.hbm [resolvable:$true] %s1110_s5 }
 0x109   :  { %v976_v8 = vunpack.c.l.b16 %v432_v4  ;;  %v1412_v4 = vld [vmem:[%s1698_s6] ss:$0 sm:$0xff]  ;;  %s1469_s6 = smov 128  }
 0x10a   :  { %v732_v41 = vpack.c.b16 %v731_v18, %v730_v17  ;;  %v1060_v10 = vpack.c.b16 %v1059_v7, %v1058_v6 }
 0x10b   :  { %v978_v24 = vpack.c.b16 %v977_v9, %v976_v8 }
 0x10c   :  { %1278 = vmatmul.msk.bf16.vlgmr.msrb.gmra.mxu2 %vm466_vm1, %v732_v41  ;;  %1296 = vmatmul.msk.bf16.vlgmr.msra.gmra.mxu1 %vm466_vm1, %v814_v15 }
 0x10d   :  { %1314 = vmatmul.msk.bf16.vlgmr.msra.gmra.mxu3 %vm466_vm1, %v896_v22  ;;  %1000 = vmatpush.bf16.msrb.mxu2 %v1395_v27 }
 0x10e   :  { %1082 = vmatpush.bf16.msra.mxu1 %v1399_v29 }
 0x111   :  { %1001 = vmatpush.bf16.msrb.mxu2 %v1394_v34 }
 0x112   :  { %1083 = vmatpush.bf16.msra.mxu1 %v1398_v37 }
 0x11c   :  { %1305 = vmatmul.msk.bf16.vlgmr.msra.gmra.mxu2 %vm466_vm1, %v855_v61  ;;  %1323 = vmatmul.msk.bf16.vlgmr.msrb.gmra.mxu1 %vm466_vm1, %v937_v57 }
 0x11d   :  { %1341 = vmatmul.msk.bf16.vlgmr.msrb.gmra.mxu3 %vm466_vm1, %v1019_v60 }
 0x11f   :  { %v513_v15 = vpop.f32.mrf.mxu2 }
 0x127   :  { %v515_v19 = vpop.f32.mrf.mxu2 }
 0x129   :  { %v479_v11 = vpop.f32.mrf.mxu1 }
 0x12a   :  { %v514_v29 = vadd.f32 %v513_v15, %v479_v11 }
 0x12c   :  { %1332 = vmatmul.msk.bf16.vlgmr.msrb.gmra.mxu2 %vm466_vm1, %v978_v24  ;;  %1350 = vmatmul.msk.bf16.vlgmr.msra.gmra.mxu1 %vm466_vm1, %v1060_v10 }
 0x131   :  { %v481_v12 = vpop.f32.mrf.mxu1 }
 0x132   :  { %v516_v36 = vadd.f32 %v515_v19, %v481_v12 }
 0x13f   :  { %v552_v13 = vpop.f32.mrf.mxu3 }
 0x140   :  { %v557_v31 = vadd.f32 %v552_v13, %v514_v29 }
 0x147   :  { %v554_v16 = vpop.f32.mrf.mxu3 }
 0x148   :  { %v558_v38 = vadd.f32 %v554_v16, %v516_v36 }
 0x149   :  { %v593_v14 = vpop.f32.mrf.mxu1 }
 0x14a   :  { %v598_v33 = vadd.f32 %v593_v14, %v557_v31 }
 0x151   :  { %v595_v17 = vpop.f32.mrf.mxu1 }
 0x152   :  { %v599_v42 = vadd.f32 %v595_v17, %v558_v38 }
 0x15f   :  { %v634_v22 = vpop.f32.mrf.mxu2 }
 0x160   :  { %v639_v34 = vadd.f32 %v634_v22, %v598_v33 }
 0x167   :  { %v636_v27 = vpop.f32.mrf.mxu2 }
 0x168   :  { %v640_v45 = vadd.f32 %v636_v27, %v599_v42 }
 0x16f   :  { %v675_v18 = vpop.f32.mrf.mxu3 }
 0x170   :  { %v680_v37 = vadd.f32 %v675_v18, %v639_v34 }
 0x177   :  { %v677_v23 = vpop.f32.mrf.mxu3 }
 0x178   :  { %v681_v48 = vadd.f32 %v677_v23, %v640_v45 }
 0x179   :  { %v716_v21 = vpop.f32.mrf.mxu1 }
 0x17a   :  { %v721_v39 = vadd.f32 %v716_v21, %v680_v37 }
 0x17f   :  { %v798_v25 = vpop.f32.mrf.mxu3 }
 0x181   :  { %v718_v26 = vpop.f32.mrf.mxu1 }
 0x182   :  { %v722_v50 = vadd.f32 %v718_v26, %v681_v48 }
 0x187   :  { %v800_v30 = vpop.f32.mrf.mxu3 }
 0x189   :  { %v839_v28 = vpop.f32.mrf.mxu1 }
 0x18f   :  { %v757_v41 = vpop.f32.mrf.mxu2 }
 0x190   :  { %v921_v40 = vpop.f32.mrf.mxu3  ;;  %v762_v43 = vadd.f32 %v757_v41, %v721_v39 }
 0x191   :  { %v841_v32 = vpop.f32.mrf.mxu1 }
 0x192   :  { %v803_v49 = vadd.f32 %v798_v25, %v762_v43 }
 0x194   :  { %v844_v52 = vadd.f32 %v839_v28, %v803_v49 }
 0x197   :  { %v759_v35 = vpop.f32.mrf.mxu2 }
 0x198   :  { %v763_v51 = vadd.f32 %v759_v35, %v722_v50  ;;  %v923_v53 = vpop.f32.mrf.mxu3 }
 0x199   :  { %v962_v44 = vpop.f32.mrf.mxu1 }
 0x19a   :  { %v804_v57 = vadd.f32 %v800_v30, %v763_v51 }
 0x19c   :  { %v845_v59 = vadd.f32 %v841_v32, %v804_v57 }
 0x19f   :  { %v880_v47 = vpop.f32.mrf.mxu2 }
 0x1a0   :  { %v885_v54 = vadd.f32 %v880_v47, %v844_v52  ;;  %v1044_v62 = vpop.f32.mrf.mxu3 }
 0x1a1   :  { %v964_v55 = vpop.f32.mrf.mxu1 }
 0x1a2   :  { %v926_v58 = vadd.f32 %v921_v40, %v885_v54 }
 0x1a4   :  { %v967_v61 = vadd.f32 %v962_v44, %v926_v58 }
 0x1a7   :  { %v882_v56 = vpop.f32.mrf.mxu2 }
 0x1a8   :  { %v886_v60 = vadd.f32 %v882_v56, %v845_v59  ;;  %v1046_v10 = vpop.f32.mrf.mxu3 }
 0x1a9   :  { %v1085_v46 = vpop.f32.mrf.mxu1 }
 0x1aa   :  { %v927_v20 = vadd.f32 %v923_v53, %v886_v60 }
 0x1ac   :  { %v968_v6 = vadd.f32 %v964_v55, %v927_v20 }
 0x1af   :  { %v1003_v63 = vpop.f32.mrf.mxu2 }
 0x1b0   :  { %v1008_v0 = vadd.f32 %v1003_v63, %v967_v61 }
 0x1b1   :  { %v1087_v11 = vpop.f32.mrf.mxu1 }
 0x1b2   :  { %v1049_v3 = vadd.f32 %v1044_v62, %v1008_v0 }
 0x1b4   :  { %v1090_v2 = vadd.f32 %v1085_v46, %v1049_v3 }
 0x1b6   :  { %v1095_v5 = vmul.f32 %v1411_v1, %v1090_v2 }
 0x1b7   :  { %v1005_v7 = vpop.f32.mrf.mxu2 }
 0x1b8   :  { %v1100_v8 = vadd.f32 %v1412_v4, %v1095_v5  ;;  %v1009_v9 = vadd.f32 %v1005_v7, %v968_v6 }
 0x1ba   :  { %1102 = vst [vmem:[#allocation5] sm:$0xff] %v1100_v8  ;;  %v1050_v24 = vadd.f32 %v1046_v10, %v1009_v9 }
 0x1bc   :  { %v1091_v12 = vadd.f32 %v1087_v11, %v1050_v24 }
 0x1be   :  { %v1096_v13 = vmul.f32 %v1411_v1, %v1091_v12 }
 0x1c0   :  { %v1101_v14 = vadd.f32 %v1412_v4, %v1096_v13 }
 0x1c2   :  { %1103 = vst [vmem:[#allocation5 + $0x8] sm:$0xff] %v1101_v14 }
 0x1c3   :  { %1116 = dma.vmem_to_hbm [thread:$0]  %s1109_s21, 256, %s1111_s5, [#allocation4], %s1469_s6, %s1469_s6, %s1470_s24  }
 0x1c4   :  { %1463 = dma.done.wait [#allocation4], 256  }
 0x1c5   :  { %1464 = vsyncadd [#allocation4], 4294967040 }
 0x1c6   :  { %1121 = vsyncpa [#allocation3], 1 }
 0x1c7   :  { %1122 = vsyncpa [#allocation4], 1 }

</bundles_post_ra>
